<compile_context>
chip_gen: v6e
topology: v6e:2x2x1
jax: 0.10.0
libtpu: 0.0.40
codegen_flags: <defaults>
</compile_context>

<pallas_src>
import functools

import jax
import jax.numpy as jnp
from jax.experimental import pallas as pl
from jax.experimental.pallas import tpu as pltpu

LANE = 128


def _round_up(x, m):
    return (x + m - 1) // m * m


# ---------------------------------------------------------------------------
# Fused kernel: (folded stand-in+fc1) -> ReLU -> (dropout=id) -> fc2
# ---------------------------------------------------------------------------

def _mlp_head_kernel(x_ref, w01_ref, b01_ref, w2_ref, b2_ref, o_ref):
    """x_ref : (TM, T, F) f32 block of the raw input sequence.

    w01_ref: (F, 64)   bf16  folded (DeepFM stand-in @ fc1) weight
    b01_ref: (1, 64)   f32   folded bias
    w2_ref : (64, 128) bf16  fc2 weight, columns zero-padded to 128 lanes (MXU)
    b2_ref : (1, 128)  f32   fc2 bias, zero-padded
    o_ref  : (TM, C)   f32   unpadded logits tile (C = num_classes)
    """
    t = x_ref.shape[1]
    # Last-timestep slice + bf16 cast fused into the kernel (no wrapper passes).
    x_last = x_ref[:, t - 1, :].astype(jnp.bfloat16)                  # (TM, F)

    # Folded stand-in projection + fc1, then ReLU.
    h1 = jnp.maximum(
        jnp.dot(x_last, w01_ref[...], preferred_element_type=jnp.float32)
        + b01_ref[...],
        0.0)                                                          # (TM, 64) f32

    # TODO(synk): F.dropout(training=True) path not emitted (eval-mode identity).

    # fc2 on the MXU against the 128-lane-padded weight; store only the real
    # num_classes columns (unpadded output array -> no 64x write inflation).
    z = (jnp.dot(h1.astype(jnp.bfloat16), w2_ref[...],
                 preferred_element_type=jnp.float32)
         + b2_ref[...])                                               # (TM, 128) f32
    o_ref[...] = z[:, :o_ref.shape[-1]].astype(o_ref.dtype)           # (TM, C)


# ---------------------------------------------------------------------------
# Parameters (deterministic, PyTorch-style U(-1/sqrt(fan_in), 1/sqrt(fan_in)))
# ---------------------------------------------------------------------------

def init_params(key, feat_dim, num_classes):
    mlp_dim, h_fc = 128, 64          # fc1 = nn.Linear(128, 64); fc2 = nn.Linear(64, C)
    ks = jax.random.split(key, 6)

    def unif(k, shape, fan_in):
        b = 1.0 / float(fan_in) ** 0.5
        return jax.random.uniform(k, shape, jnp.float32, -b, b)

    return {
        "w_mlp": unif(ks[0], (feat_dim, mlp_dim), feat_dim),   # DeepFM stand-in
        "b_mlp": unif(ks[1], (mlp_dim,), feat_dim),
        "w1":    unif(ks[2], (mlp_dim, h_fc), mlp_dim),
        "b1":    unif(ks[3], (h_fc,), mlp_dim),
        "w2":    unif(ks[4], (h_fc, num_classes), h_fc),
        "b2":    unif(ks[5], (num_classes,), h_fc),
    }


# ---------------------------------------------------------------------------
# Forward pass
# ---------------------------------------------------------------------------

def mlp_forward(params, x, x_lengths=None, *, tile_m=512, min_grid_steps=1):
    """x: (N, T, F) float32.  x_lengths accepted but unused (as in the reference).

    tile_m:         row-tile size (multiple of 8).  512 is near the HBM-roofline
                    sweet spot on v5e/v6e/v7x; sweep {256, 512, 1024} if needed.
    min_grid_steps: set to 2 on v7x (2 TensorCores/chip) so moderate N still
                    yields >=2 "parallel" grid steps; keep 1 on v5e/v6e.
    """
    del x_lengths
    N, T, F = x.shape
    h_fc = params["w1"].shape[1]            # 64
    C = params["w2"].shape[1]               # num_classes

    # --- Fold the linear DeepFM stand-in into fc1 (exact: no nonlinearity
    # between them).  Fold in f32, cast to bf16 for the MXU.
    w01 = jnp.dot(params["w_mlp"], params["w1"],
                  preferred_element_type=jnp.float32).astype(jnp.bfloat16)  # (F, 64)
    b01 = (jnp.dot(params["b_mlp"], params["w1"],
                   preferred_element_type=jnp.float32)
           + params["b1"]).reshape(1, h_fc)                                 # (1, 64) f32

    # fc2: columns zero-padded to 128 lanes for a natural MXU/vreg layout; the
    # kernel stores only the first C columns so the padding never hits HBM.
    c_pad = _round_up(C, LANE)
    w2p = jnp.pad(params["w2"], ((0, 0), (0, c_pad - C))).astype(jnp.bfloat16)
    b2p = jnp.pad(params["b2"], (0, c_pad - C)).reshape(1, c_pad)

    # --- Row tiling: multiple of 8, capped at tile_m; optionally split so the
    # grid has >= min_grid_steps steps (v7x megacore).
    tm = min(tile_m, _round_up(max(N, 8), 8))
    if min_grid_steps > 1:
        tm = min(tm, _round_up(pl.cdiv(N, min_grid_steps), 8))
    tm = max(tm, 8)
    n_pad = _round_up(N, tm)

    # x stays f32 and 3-D; padded along N only when the tile does not divide
    # (zero-copy in the common divisible case).  Slice + cast happen in-kernel.
    x_in = x if n_pad == N else jnp.pad(x, ((0, n_pad - N), (0, 0), (0, 0)))

    full = lambda i: (0, 0)                 # resident weights, loaded once
    out = pl.pallas_call(
        _mlp_head_kernel,
        out_shape=jax.ShapeDtypeStruct((n_pad, C), jnp.float32),
        grid_spec=pltpu.PrefetchScalarGridSpec(
            num_scalar_prefetch=0,
            grid=(n_pad // tm,),
            in_specs=[
                pl.BlockSpec((tm, T, F), lambda i: (i, 0, 0)),   # raw x rows
                pl.BlockSpec((F, h_fc), full),                   # folded W01
                pl.BlockSpec((1, h_fc), full),                   # folded b01
                pl.BlockSpec((h_fc, c_pad), full),               # fc2 W (padded)
                pl.BlockSpec((1, c_pad), full),                  # fc2 b (padded)
            ],
            out_specs=pl.BlockSpec((tm, C), lambda i: (i, 0)),   # unpadded logits
        ),
        compiler_params=pltpu.CompilerParams(
            dimension_semantics=("parallel",)),
    )(x_in, w01, b01, w2p, b2p)

    return out[:N]


# ---------------------------------------------------------------------------
# Demo
# ---------------------------------------------------------------------------

if __name__ == "__main__":
    N, T, F = 2, 8, 16          # batch, seq_len, per-timestep raw feature dim
    NUM_CLASSES = 2

    key = jax.random.PRNGKey(0)
    k_params, k_x = jax.random.split(key)

    params = init_params(k_params, F, NUM_CLASSES)

    x = jax.random.normal(k_x, (N, T, F), dtype=jnp.float32)
    x_lengths = jnp.array([T, T - 3], dtype=jnp.int32)   # unused by the forward

    fwd = jax.jit(functools.partial(mlp_forward))
    out = fwd(params, x, x_lengths)
    jax.block_until_ready(out)

    assert out.shape == (N, NUM_CLASSES)
    assert out.dtype == jnp.float32
    assert bool(jnp.all(jnp.isfinite(out)))
    print("KERNEL_OK")
</pallas_src>

<mosaic_0001>
module attributes {stable_mosaic.version = 11 : i64} {
  func.func @_mlp_head_kernel(%arg0: i32, %arg1: memref<8x8x16xf32, #tpu.memory_space<vmem>>, %arg2: memref<16x64xbf16, #tpu.memory_space<vmem>>, %arg3: memref<1x64xf32, #tpu.memory_space<vmem>>, %arg4: memref<64x128xbf16, #tpu.memory_space<vmem>>, %arg5: memref<1x128xf32, #tpu.memory_space<vmem>>, %arg6: memref<8x2xf32, #tpu.memory_space<vmem>>) attributes {dimension_semantics = [#tpu.dimension_semantics<parallel>], iteration_bounds = array<i64: 1>, scalar_prefetch = 0 : i64, scratch_operands = 0 : i64, tpu.core_type = #tpu.core_type<tc>, window_params = [{transform_indices = @transform_0, window_bounds = array<i64: 8, 8, 16>}, {pipeline_mode = #tpu.pipeline_mode<synchronous>, transform_indices = @transform_1, window_bounds = array<i64: 16, 64>}, {pipeline_mode = #tpu.pipeline_mode<synchronous>, transform_indices = @transform_2, window_bounds = array<i64: 1, 64>}, {pipeline_mode = #tpu.pipeline_mode<synchronous>, transform_indices = @transform_3, window_bounds = array<i64: 64, 128>}, {pipeline_mode = #tpu.pipeline_mode<synchronous>, transform_indices = @transform_4, window_bounds = array<i64: 1, 128>}, {transform_indices = @transform_5, window_bounds = array<i64: 8, 2>}]} {
    %c0 = arith.constant 0 : index
    %c7 = arith.constant 7 : index
    %c0_0 = arith.constant 0 : index
    %0 = vector.load %arg1[%c0, %c7, %c0_0] : memref<8x8x16xf32, #tpu.memory_space<vmem>>, vector<8x1x16xf32>
    %1 = vector.shape_cast %0 : vector<8x1x16xf32> to vector<8x16xf32>
    %2 = arith.truncf %1 : vector<8x16xf32> to vector<8x16xbf16>
    %c0_1 = arith.constant 0 : index
    %c0_2 = arith.constant 0 : index
    %3 = vector.load %arg2[%c0_1, %c0_2] : memref<16x64xbf16, #tpu.memory_space<vmem>>, vector<16x64xbf16>
    %cst = arith.constant dense<0.000000e+00> : vector<8x64xf32>
    %4 = tpu.matmul %2, %3, %cst {dimension_numbers = #tpu.dot_dimension_numbers<[1], [0], [0], [1], [0, 0, 1, 1], [], []>} : vector<8x16xbf16>, vector<16x64xbf16>, vector<8x64xf32> -> vector<8x64xf32>
    %c0_3 = arith.constant 0 : index
    %c0_4 = arith.constant 0 : index
    %5 = vector.load %arg3[%c0_3, %c0_4] : memref<1x64xf32, #tpu.memory_space<vmem>>, vector<1x64xf32>
    %6 = vector.broadcast %5 : vector<1x64xf32> to vector<8x64xf32>
    %7 = arith.addf %4, %6 : vector<8x64xf32>
    %cst_5 = arith.constant 0.000000e+00 : f32
    %8 = vector.broadcast %cst_5 : f32 to vector<8x64xf32>
    %9 = arith.maximumf %7, %8 : vector<8x64xf32>
    %10 = arith.truncf %9 : vector<8x64xf32> to vector<8x64xbf16>
    %c0_6 = arith.constant 0 : index
    %c0_7 = arith.constant 0 : index
    %11 = vector.load %arg4[%c0_6, %c0_7] : memref<64x128xbf16, #tpu.memory_space<vmem>>, vector<64x128xbf16>
    %cst_8 = arith.constant dense<0.000000e+00> : vector<8x128xf32>
    %12 = tpu.matmul %10, %11, %cst_8 {dimension_numbers = #tpu.dot_dimension_numbers<[1], [0], [0], [1], [0, 0, 1, 1], [], []>} : vector<8x64xbf16>, vector<64x128xbf16>, vector<8x128xf32> -> vector<8x128xf32>
    %c0_9 = arith.constant 0 : index
    %c0_10 = arith.constant 0 : index
    %13 = vector.load %arg5[%c0_9, %c0_10] : memref<1x128xf32, #tpu.memory_space<vmem>>, vector<1x128xf32>
    %14 = vector.broadcast %13 : vector<1x128xf32> to vector<8x128xf32>
    %15 = arith.addf %12, %14 : vector<8x128xf32>
    %16 = vector.extract_strided_slice %15 {offsets = [0, 0], sizes = [8, 2], strides = [1, 1]} : vector<8x128xf32> to vector<8x2xf32>
    %c0_11 = arith.constant 0 : index
    %c0_12 = arith.constant 0 : index
    %17 = vector.load %arg6[%c0_11, %c0_12] : memref<8x2xf32, #tpu.memory_space<vmem>>, vector<8x2xf32>
    tpu.vector_store %arg6[%c0_11, %c0_12], %16 {strides = array<i32>} : memref<8x2xf32, #tpu.memory_space<vmem>>, vector<8x2xf32>,
    return
  }
  func.func @transform_0(%arg0: i32) -> (i32, i32, i32) {
    %c0_i32 = arith.constant 0 : i32
    %c0_i32_0 = arith.constant 0 : i32
    %c0_i32_1 = arith.constant 0 : i32
    return %arg0, %c0_i32, %c0_i32_0 : i32, i32, i32
  }
  func.func @transform_1(%arg0: i32) -> (i32, i32) {
    %c0_i32 = arith.constant 0 : i32
    %c0_i32_0 = arith.constant 0 : i32
    %c0_i32_1 = arith.constant 0 : i32
    return %c0_i32, %c0_i32_0 : i32, i32
  }
  func.func @transform_2(%arg0: i32) -> (i32, i32) {
    %c0_i32 = arith.constant 0 : i32
    %c0_i32_0 = arith.constant 0 : i32
    %c0_i32_1 = arith.constant 0 : i32
    return %c0_i32, %c0_i32_0 : i32, i32
  }
  func.func @transform_3(%arg0: i32) -> (i32, i32) {
    %c0_i32 = arith.constant 0 : i32
    %c0_i32_0 = arith.constant 0 : i32
    %c0_i32_1 = arith.constant 0 : i32
    return %c0_i32, %c0_i32_0 : i32, i32
  }
  func.func @transform_4(%arg0: i32) -> (i32, i32) {
    %c0_i32 = arith.constant 0 : i32
    %c0_i32_0 = arith.constant 0 : i32
    %c0_i32_1 = arith.constant 0 : i32
    return %c0_i32, %c0_i32_0 : i32, i32
  }
  func.func @transform_5(%arg0: i32) -> (i32, i32) {
    %c0_i32 = arith.constant 0 : i32
    %c0_i32_0 = arith.constant 0 : i32
    return %arg0, %c0_i32 : i32, i32
  }
}

</mosaic_0001>

<bundles_post_ra>
// kernel: mlp_forward.1
= control target key start
LH: loop header
LB: loop body
LE: loop exit
PB: predicated region body
PF: predicated region fallthrough
CT: control target
= control target key end

     0   :  { %v266_v0 = vmov 0.0   ;;  %vm267_vm0 = vmmov 0   ;;  %vm63_vm1 = vcmask 1041409   ;;  %vm66_vm2 = vcmask 1042434   ;;  %s354_s1 = inlined_call_operand.vmem [shape: bf16[16,64], index: 1, kind: input, shape index: {}]   ;;  %s355_s0 = inlined_call_operand.vmem [shape: f32[8,8,16], index: 0, kind: input, shape index: {}]   ;;  %s356_s3 = inlined_call_operand.vmem [shape: bf16[64,128], index: 3, kind: input, shape index: {}]   ;;  %s357_s2 = inlined_call_operand.vmem [shape: f32[1,64], index: 2, kind: input, shape index: {}]   ;;  %s358_s4 = inlined_call_operand.vmem [shape: f32[1,128], index: 4, kind: input, shape index: {}]   ;;  %s359_s5 = inlined_call_operand.vmem [shape: f32[8,2], index: 5, kind: output, shape index: {}]  }
   0x1   :  { %241 = vmatprep.subr.bf16.mxu0 %v266_v0  ;;  %v261_v1 = vld [vmem:[%s354_s1] sm:$0xff]   ;;  %243 = vmatprep.mubr.msk.bf16.mxu0 %vm267_vm0, %v266_v0  ;;  %v22_v3 = vld [vmem:[%s355_s0 + $0xf] sm:$0x1]  ;;  %v23_v4 = vld [vmem:[%s355_s0 + $0x17] sm:$0x1]  ;;  %vm69_vm3 = vcmask 1043459  }
   0x2   :  { %v21_v2 = vld [vmem:[%s355_s0 + $0x7] sm:$0x1]  ;;  %247 = vmatprep.subr.bf16.mxu1 %v266_v0  ;;  %255 = vmatprep.mubr.msk.bf16.mxu1 %vm267_vm0, %v266_v0  ;;  %v24_v5 = vld [vmem:[%s355_s0 + $0x1f] sm:$0x1]  ;;  %v26_v7 = vld [vmem:[%s355_s0 + $0x2f] sm:$0x1]  ;;  %v30_v9 = vpack.c.bf16 %v22_v3, %v22_v3  ;;  %v31_v10 = vpack.c.bf16 %v23_v4, %v23_v4 }
   0x3   :  { %242 = vmatpush3.bf16.msra.mxu0 %v261_v1  ;;  %v25_v6 = vld [vmem:[%s355_s0 + $0x27] sm:$0x1]  ;;  %v29_v8 = vpack.c.bf16 %v21_v2, %v21_v2  ;;  %v27_v11 = vld [vmem:[%s355_s0 + $0x37] sm:$0x1]  ;;  %v28_v12 = vld [vmem:[%s355_s0 + $0x3f] sm:$0x1]  ;;  %v32_v13 = vpack.c.bf16 %v24_v5, %v24_v5  ;;  %v34_v15 = vpack.c.bf16 %v26_v7, %v26_v7 }
   0x4   :  { %v33_v14 = vpack.c.bf16 %v25_v6, %v25_v6  ;;  %v262_v16 = vld [vmem:[%s356_s3 + $0x18] sm:$0xff]   ;;  %v35_v17 = vpack.c.bf16 %v27_v11, %v27_v11  ;;  %v36_v18 = vpack.c.bf16 %v28_v12, %v28_v12  ;;  %v55_v20 = vunpack.c.l.b16 %v30_v9  ;;  %v263_v25 = vld [vmem:[%s356_s3 + $0x10] sm:$0xff]   ;;  %v264_v43 = vld [vmem:[%s356_s3 + $0x8] sm:$0xff]  }
   0x5   :  { %v54_v19 = vunpack.c.l.b16 %v29_v8  ;;  %v56_v21 = vunpack.c.l.b16 %v31_v10  ;;  %v57_v22 = vunpack.c.l.b16 %v32_v13  ;;  %v59_v24 = vunpack.c.l.b16 %v34_v15  ;;  %248 = vmatpush3.bf16.msra.mxu1 %v262_v16  ;;  %v265_v44 = vld [vmem:[%s356_s3] sm:$0xff]  }
   0x6   :  { %v58_v23 = vunpack.c.l.b16 %v33_v14  ;;  %v60_v26 = vunpack.c.l.b16 %v35_v17  ;;  %v61_v27 = vunpack.c.l.b16 %v36_v18  ;;  %v62_v28 = vrot.slane %v55_v20, 7  ;;  %249 = vmatprep.subr.bf16.mxu1 %v266_v0  ;;  %v225_v45 = vld [vmem:[%s357_s2] ss:$0 sm:$0xff] }
   0x7   :  { %v65_v29 = vrot.slane %v56_v21, 6  ;;  %v68_v30 = vrot.slane %v57_v22, 5  ;;  %vm72_vm4 = vcmask 1044484   ;;  %v74_v33 = vrot.slane %v59_v24, 3  ;;  %v228_v53 = vld [vmem:[%s358_s4] ss:$0 sm:$0xff] }
   0x8   :  { %v71_v31 = vrot.slane %v58_v23, 4  ;;  %v64_v32 = vsel %vm63_vm1, %v62_v28, %v54_v19  ;;  %vm75_vm5 = vcmask 1045509   ;;  %v77_v35 = vrot.slane %v60_v26, 2 }
   0x9   :  { %v67_v34 = vsel %vm66_vm2, %v65_v29, %v64_v32  ;;  %250 = vmatpush3.bf16.msra.mxu1 %v263_v25  ;;  %vm78_vm6 = vcmask 1046534   ;;  %v80_v37 = vrot.slane %v61_v27, 1  ;;  %vm81_vm7 = vcmask 1047559  }
   0xa   :  { %v70_v36 = vsel %vm69_vm3, %v68_v30, %v67_v34  ;;  %251 = vmatprep.subr.bf16.mxu1 %v266_v0  ;;  %vm90_vm8 = vcmask 130048   ;;  %vm175_vm9 = vcmask 523264   ;;  %vm219_vm10 = vcmask 15360  }
   0xb   :  { %v73_v38 = vsel %vm72_vm4, %v71_v31, %v70_v36 }
   0xc   :  { %v76_v39 = vsel %vm75_vm5, %v74_v33, %v73_v38 }
   0xd   :  { %v79_v40 = vsel %vm78_vm6, %v77_v35, %v76_v39  ;;  %252 = vmatpush3.bf16.msra.mxu1 %v264_v43 }
   0xe   :  { %v82_v41 = vsel %vm81_vm7, %v80_v37, %v79_v40  ;;  %253 = vmatprep.subr.bf16.mxu1 %v266_v0 }
   0xf   :  { %v83_v42 = vpack.c.b16 %v82_v41, %v82_v41 }
  0x11   :  { %244 = vmatmul.mubr.msk.bf16.vlgmr.msra.gmra.mxu0 %vm90_vm8, %v83_v42  ;;  %254 = vmatpush3.bf16.msra.mxu1 %v265_v44 }
  0xd1   :  { %v128_v46 = vpop.f32.mrf.mxu0 }
  0xd2   :  { %v129_v47 = vadd.f32 %v225_v45, %v128_v46 }
  0xd3   :  { %v245_v48 = vpop.f32.mrf.mxu0 }
  0xd4   :  { %v134_v49 = vmax.f32 %v129_v47, 0.0 }
  0xd5   :  { %v131_v50 = vpop.f32.mrf.mxu0 }
  0xd6   :  { %v135_v51 = vpack.c.bf16 %v134_v49, %v134_v49 }
  0xd7   :  { %v246_v52 = vpop.f32.mrf.mxu0 }
  0xd8   :  { %256 = vmatmul.mubr.msk.bf16.vlgmr.msra.gmra.mxu1 %vm175_vm9, %v135_v51 }
 0x198   :  { %v213_v54 = vpop.f32.mrf.mxu1 }
 0x199   :  { %v214_v55 = vadd.f32 %v228_v53, %v213_v54 }
 0x19a   :  { %v257_v56 = vpop.f32.mrf.mxu1 }
 0x19b   :  { %220 = vst.msk [vmem:[%s359_s5] sm:$0xff] %vm219_vm10, %v214_v55 }
 0x19c   :  { %v216_v57 = vpop.f32.mrf.mxu1 }
 0x19e   :  { %v258_v58 = vpop.f32.mrf.mxu1 }

</bundles_post_ra>
